<compile_context>
chip_gen: v5e
topology: v5e:2x2
jax: 0.10.0
libtpu: 0.0.40
codegen_flags: <defaults>
</compile_context>

<pallas_src>
import math
import jax
import jax.numpy as jnp
from jax.experimental import pallas as pl
from jax.experimental.pallas import tpu as pltpu

_LANE = 128
_SUBLANE = 8


def _round_up(x, m):
    return (x + m - 1) // m * m


# --------------------------------------------------------------------------- #
# Kernel: whole MLP fused for one batch tile.  Weights/biases are resident
# (constant index_map), only x / out stream over the batch grid axis.
# --------------------------------------------------------------------------- #
def qnet_kernel(x_ref, w1_ref, b1_ref, w2_ref, b2_ref, w3_ref, b3_ref, o_ref):
    x = x_ref[...]                                                     # f32 [bt, S]
    h = jnp.dot(x, w1_ref[...], preferred_element_type=jnp.float32) + b1_ref[...]
    h = jnp.maximum(h, 0.0)                                            # ReLU (VPU, f32)
    h = jnp.dot(h, w2_ref[...], preferred_element_type=jnp.float32) + b2_ref[...]
    h = jnp.maximum(h, 0.0)
    q = jnp.dot(h, w3_ref[...], preferred_element_type=jnp.float32) + b3_ref[...]
    o_ref[...] = q.astype(o_ref.dtype)                                 # bf16 lane-dense store


# --------------------------------------------------------------------------- #
# One-time parameter preparation (call once, reuse across forwards).
# --------------------------------------------------------------------------- #
def prepare_qnet_params(params):
    """Pad the last layer to a 128-lane-dense output slab. Do NOT call per forward."""
    act = params["w3"].shape[-1]
    act_pad = _round_up(act, _LANE)
    f32 = jnp.float32
    w3 = jnp.pad(params["w3"].astype(f32), ((0, 0), (0, act_pad - act)))
    b3 = jnp.pad(params["b3"].astype(f32).reshape(1, -1), ((0, 0), (0, act_pad - act)))
    prepped = {
        "w1": params["w1"].astype(f32),
        "b1": params["b1"].astype(f32).reshape(1, -1),
        "w2": params["w2"].astype(f32),
        "b2": params["b2"].astype(f32).reshape(1, -1),
        "w3": w3,
        "b3": b3,
    }
    return prepped, act


# --------------------------------------------------------------------------- #
# batch_tile policy.
# --------------------------------------------------------------------------- #
def _pick_batch_tile(B, state_dim, h0, h1, act_pad, out_itemsize):
    # Per-row VMEM footprint: double-buffered x + out streams, plus generous
    # margin for the (batch_tile, h) f32 intermediates / relayouts.
    row_bytes = 2 * state_dim * 4 + 2 * act_pad * out_itemsize + 4 * (h0 + h1) * 4
    budget = 40 * 1024 * 1024            # fits v7x's 64 MiB physical with headroom
    cap = max(_SUBLANE, min(4096, budget // max(row_bytes, 1)))
    cap -= cap % _SUBLANE

    B8 = _round_up(max(B, 1), _SUBLANE)
    if B8 <= _SUBLANE:
        return _SUBLANE
    # >= 2 grid steps so the batch axis pipelines / shards across TensorCores;
    # prefer an EVEN step count (balanced across v7x's two cores), then fewer steps.
    s_min = max(2, -(-B8 // cap))
    best_tile, best_key = None, None
    for steps in range(s_min, s_min + 8):
        tile = min(cap, _round_up(-(-B8 // steps), _SUBLANE))
        g = -(-B // tile)
        key = (g % 2, g, tile)
        if best_key is None or key < best_key:
            best_key, best_tile = key, tile
    return best_tile


# --------------------------------------------------------------------------- #
# Forward wrapper.
# --------------------------------------------------------------------------- #
def qnet_forward(x, prepped, action_dim, *, out_dtype=jnp.bfloat16, batch_tile=None):
    """x: [B, state_dim] float32. prepped: output of prepare_qnet_params."""
    x = x.astype(jnp.float32)            # no-op for f32 inputs
    B, state_dim = x.shape
    w1, b1, w2, b2, w3, b3 = (prepped[k] for k in ("w1", "b1", "w2", "b2", "w3", "b3"))
    h0, h1, act_pad = w1.shape[1], w2.shape[1], w3.shape[1]
    assert w1.shape[0] == state_dim

    out_itemsize = jnp.dtype(out_dtype).itemsize
    if batch_tile is None:
        batch_tile = _pick_batch_tile(B, state_dim, h0, h1, act_pad, out_itemsize)
    batch_tile = max(_SUBLANE, _round_up(batch_tile, _SUBLANE))
    grid_b = pl.cdiv(B, batch_tile)      # ragged last tile handled by Pallas OOB masking

    full = lambda r, c: pl.BlockSpec((r, c), lambda i: (0, 0))   # resident across grid
    in_specs = [
        pl.BlockSpec((batch_tile, state_dim), lambda i: (i, 0)),  # x streams over batch
        full(state_dim, h0), full(1, h0),
        full(h0, h1), full(1, h1),
        full(h1, act_pad), full(1, act_pad),
    ]
    out_spec = pl.BlockSpec((batch_tile, act_pad), lambda i: (i, 0))

    flops = 2 * B * (state_dim * h0 + h0 * h1 + h1 * act_pad)
    bytes_accessed = (
        x.size * 4
        + B * act_pad * out_itemsize
        + sum(int(a.size) * 4 for a in (w1, b1, w2, b2, w3, b3))
    )

    out = pl.pallas_call(
        qnet_kernel,
        out_shape=jax.ShapeDtypeStruct((B, act_pad), out_dtype),
        grid_spec=pltpu.PrefetchScalarGridSpec(
            num_scalar_prefetch=0,
            grid=(grid_b,),
            in_specs=in_specs,
            out_specs=out_spec,
        ),
        compiler_params=pltpu.CompilerParams(
            dimension_semantics=("parallel",),
            vmem_limit_bytes=48 * 1024 * 1024,
        ),
        cost_estimate=pl.CostEstimate(
            flops=flops, transcendentals=0, bytes_accessed=bytes_accessed),
    )(x, w1, b1, w2, b2, w3, b3)

    return out[:, :action_dim]


# --------------------------------------------------------------------------- #
# Init (matches torch: xavier_uniform_ weights, bias = 0.01) and references.
# --------------------------------------------------------------------------- #
def xavier_uniform(key, fan_in, fan_out, dtype=jnp.float32):
    bound = math.sqrt(6.0 / (fan_in + fan_out))
    return jax.random.uniform(key, (fan_in, fan_out), dtype, -bound, bound)


def init_qnet_params(key, state_dim, action_dim, n_hidden_units):
    k1, k2, k3 = jax.random.split(key, 3)
    h0, h1 = n_hidden_units
    return {
        "w1": xavier_uniform(k1, state_dim, h0),
        "b1": jnp.full((1, h0), 0.01, jnp.float32),
        "w2": xavier_uniform(k2, h0, h1),
        "b2": jnp.full((1, h1), 0.01, jnp.float32),
        "w3": xavier_uniform(k3, h1, action_dim),
        "b3": jnp.full((1, action_dim), 0.01, jnp.float32),
    }


def qnet_reference_f32(x, p):
    h = jnp.maximum(x @ p["w1"] + p["b1"], 0.0)
    h = jnp.maximum(h @ p["w2"] + p["b2"], 0.0)
    return h @ p["w3"] + p["b3"]


if __name__ == "__main__":
    key = jax.random.PRNGKey(0)
    k_param, k_x = jax.random.split(key)

    batch = 12                       # non-multiple of 8: exercises the ragged last tile
    state_dim = 16
    n_hidden_units = (32, 32)
    action_dim = 8

    params = init_qnet_params(k_param, state_dim, action_dim, n_hidden_units)
    x = jax.random.normal(k_x, (batch, state_dim), jnp.float32)

    # One-time param prep (cached across calls), jitted forward.
    prepped, act = prepare_qnet_params(params)
    fwd = jax.jit(qnet_forward, static_argnums=(2,))

    q = fwd(x, prepped, act)
    q = jax.block_until_ready(q)
    assert q.shape == (batch, action_dim)

    # Compute is f32 end-to-end; only the output store is bf16 (~0.4% rounding).
    q_ref = qnet_reference_f32(x, params)
    assert jnp.allclose(q.astype(jnp.float32), q_ref, atol=2e-2, rtol=2e-2), \
        "mismatch vs f32 reference"

    print("KERNEL_OK")
</pallas_src>

<mosaic_0001>
module attributes {stable_mosaic.version = 11 : i64} {
  func.func @qnet_kernel(%arg0: i32, %arg1: memref<8x16xf32, #tpu.memory_space<vmem>>, %arg2: memref<16x32xf32, #tpu.memory_space<vmem>>, %arg3: memref<1x32xf32, #tpu.memory_space<vmem>>, %arg4: memref<32x32xf32, #tpu.memory_space<vmem>>, %arg5: memref<1x32xf32, #tpu.memory_space<vmem>>, %arg6: memref<32x128xf32, #tpu.memory_space<vmem>>, %arg7: memref<1x128xf32, #tpu.memory_space<vmem>>, %arg8: memref<8x128xbf16, #tpu.memory_space<vmem>>) attributes {dimension_semantics = [#tpu.dimension_semantics<parallel>], iteration_bounds = array<i64: 2>, scalar_prefetch = 0 : i64, scratch_operands = 0 : i64, tpu.core_type = #tpu.core_type<tc>, window_params = [{transform_indices = @transform_0, window_bounds = array<i64: 8, 16>}, {pipeline_mode = #tpu.pipeline_mode<synchronous>, transform_indices = @transform_1, window_bounds = array<i64: 16, 32>}, {pipeline_mode = #tpu.pipeline_mode<synchronous>, transform_indices = @transform_2, window_bounds = array<i64: 1, 32>}, {pipeline_mode = #tpu.pipeline_mode<synchronous>, transform_indices = @transform_3, window_bounds = array<i64: 32, 32>}, {pipeline_mode = #tpu.pipeline_mode<synchronous>, transform_indices = @transform_4, window_bounds = array<i64: 1, 32>}, {pipeline_mode = #tpu.pipeline_mode<synchronous>, transform_indices = @transform_5, window_bounds = array<i64: 32, 128>}, {pipeline_mode = #tpu.pipeline_mode<synchronous>, transform_indices = @transform_6, window_bounds = array<i64: 1, 128>}, {transform_indices = @transform_7, window_bounds = array<i64: 8, 128>}]} {
    %c0 = arith.constant 0 : index
    %c0_0 = arith.constant 0 : index
    %0 = vector.load %arg1[%c0, %c0_0] : memref<8x16xf32, #tpu.memory_space<vmem>>, vector<8x16xf32>
    %c0_1 = arith.constant 0 : index
    %c0_2 = arith.constant 0 : index
    %1 = vector.load %arg2[%c0_1, %c0_2] : memref<16x32xf32, #tpu.memory_space<vmem>>, vector<16x32xf32>
    %cst = arith.constant dense<0.000000e+00> : vector<8x32xf32>
    %2 = tpu.matmul %0, %1, %cst {dimension_numbers = #tpu.dot_dimension_numbers<[1], [0], [0], [1], [0, 0, 1, 1], [], []>} : vector<8x16xf32>, vector<16x32xf32>, vector<8x32xf32> -> vector<8x32xf32>
    %c0_3 = arith.constant 0 : index
    %c0_4 = arith.constant 0 : index
    %3 = vector.load %arg3[%c0_3, %c0_4] : memref<1x32xf32, #tpu.memory_space<vmem>>, vector<1x32xf32>
    %4 = vector.broadcast %3 : vector<1x32xf32> to vector<8x32xf32>
    %5 = arith.addf %2, %4 : vector<8x32xf32>
    %cst_5 = arith.constant 0.000000e+00 : f32
    %6 = vector.broadcast %cst_5 : f32 to vector<8x32xf32>
    %7 = arith.maximumf %5, %6 : vector<8x32xf32>
    %c0_6 = arith.constant 0 : index
    %c0_7 = arith.constant 0 : index
    %8 = vector.load %arg4[%c0_6, %c0_7] : memref<32x32xf32, #tpu.memory_space<vmem>>, vector<32x32xf32>
    %cst_8 = arith.constant dense<0.000000e+00> : vector<8x32xf32>
    %9 = tpu.matmul %7, %8, %cst_8 {dimension_numbers = #tpu.dot_dimension_numbers<[1], [0], [0], [1], [0, 0, 1, 1], [], []>} : vector<8x32xf32>, vector<32x32xf32>, vector<8x32xf32> -> vector<8x32xf32>
    %c0_9 = arith.constant 0 : index
    %c0_10 = arith.constant 0 : index
    %10 = vector.load %arg5[%c0_9, %c0_10] : memref<1x32xf32, #tpu.memory_space<vmem>>, vector<1x32xf32>
    %11 = vector.broadcast %10 : vector<1x32xf32> to vector<8x32xf32>
    %12 = arith.addf %9, %11 : vector<8x32xf32>
    %cst_11 = arith.constant 0.000000e+00 : f32
    %13 = vector.broadcast %cst_11 : f32 to vector<8x32xf32>
    %14 = arith.maximumf %12, %13 : vector<8x32xf32>
    %c0_12 = arith.constant 0 : index
    %c0_13 = arith.constant 0 : index
    %15 = vector.load %arg6[%c0_12, %c0_13] : memref<32x128xf32, #tpu.memory_space<vmem>>, vector<32x128xf32>
    %cst_14 = arith.constant dense<0.000000e+00> : vector<8x128xf32>
    %16 = tpu.matmul %14, %15, %cst_14 {dimension_numbers = #tpu.dot_dimension_numbers<[1], [0], [0], [1], [0, 0, 1, 1], [], []>} : vector<8x32xf32>, vector<32x128xf32>, vector<8x128xf32> -> vector<8x128xf32>
    %c0_15 = arith.constant 0 : index
    %c0_16 = arith.constant 0 : index
    %17 = vector.load %arg7[%c0_15, %c0_16] : memref<1x128xf32, #tpu.memory_space<vmem>>, vector<1x128xf32>
    %18 = vector.broadcast %17 : vector<1x128xf32> to vector<8x128xf32>
    %19 = arith.addf %16, %18 : vector<8x128xf32>
    %20 = arith.truncf %19 : vector<8x128xf32> to vector<8x128xbf16>
    %c0_17 = arith.constant 0 : index
    %c0_18 = arith.constant 0 : index
    %21 = vector.load %arg8[%c0_17, %c0_18] : memref<8x128xbf16, #tpu.memory_space<vmem>>, vector<8x128xbf16>
    tpu.vector_store %arg8[%c0_17, %c0_18], %20 {strides = array<i32>} : memref<8x128xbf16, #tpu.memory_space<vmem>>, vector<8x128xbf16>,
    return
  }
  func.func @transform_0(%arg0: i32) -> (i32, i32) {
    %c0_i32 = arith.constant 0 : i32
    %c0_i32_0 = arith.constant 0 : i32
    return %arg0, %c0_i32 : i32, i32
  }
  func.func @transform_1(%arg0: i32) -> (i32, i32) {
    %c0_i32 = arith.constant 0 : i32
    %c0_i32_0 = arith.constant 0 : i32
    %c0_i32_1 = arith.constant 0 : i32
    return %c0_i32, %c0_i32_0 : i32, i32
  }
  func.func @transform_2(%arg0: i32) -> (i32, i32) {
    %c0_i32 = arith.constant 0 : i32
    %c0_i32_0 = arith.constant 0 : i32
    %c0_i32_1 = arith.constant 0 : i32
    return %c0_i32, %c0_i32_0 : i32, i32
  }
  func.func @transform_3(%arg0: i32) -> (i32, i32) {
    %c0_i32 = arith.constant 0 : i32
    %c0_i32_0 = arith.constant 0 : i32
    %c0_i32_1 = arith.constant 0 : i32
    return %c0_i32, %c0_i32_0 : i32, i32
  }
  func.func @transform_4(%arg0: i32) -> (i32, i32) {
    %c0_i32 = arith.constant 0 : i32
    %c0_i32_0 = arith.constant 0 : i32
    %c0_i32_1 = arith.constant 0 : i32
    return %c0_i32, %c0_i32_0 : i32, i32
  }
  func.func @transform_5(%arg0: i32) -> (i32, i32) {
    %c0_i32 = arith.constant 0 : i32
    %c0_i32_0 = arith.constant 0 : i32
    %c0_i32_1 = arith.constant 0 : i32
    return %c0_i32, %c0_i32_0 : i32, i32
  }
  func.func @transform_6(%arg0: i32) -> (i32, i32) {
    %c0_i32 = arith.constant 0 : i32
    %c0_i32_0 = arith.constant 0 : i32
    %c0_i32_1 = arith.constant 0 : i32
    return %c0_i32, %c0_i32_0 : i32, i32
  }
  func.func @transform_7(%arg0: i32) -> (i32, i32) {
    %c0_i32 = arith.constant 0 : i32
    %c0_i32_0 = arith.constant 0 : i32
    return %arg0, %c0_i32 : i32, i32
  }
}

</mosaic_0001>

<bundles_post_ra>
// kernel: qnet_forward.1
= control target key start
LH: loop header
LB: loop body
LE: loop exit
PB: predicated region body
PF: predicated region fallthrough
CT: control target
= control target key end

     0   :  { %12 = vsyncpa [#allocation3], 0  ;;  %s1044_s0 = inlined_call_operand.hbm [shape: f32[12,16], index: 0, kind: input, shape index: {}]   ;;  %s1045_s1 = inlined_call_operand.hbm [shape: f32[16,32], index: 1, kind: input, shape index: {}]   ;;  %s1046_s2 = inlined_call_operand.hbm [shape: f32[1,32], index: 2, kind: input, shape index: {}]   ;;  %s1047_s3 = inlined_call_operand.hbm [shape: f32[32,32], index: 3, kind: input, shape index: {}]   ;;  %s1048_s4 = inlined_call_operand.vmem [shape: f32[1,32], index: 4, kind: input, shape index: {}]   ;;  %s1049_s5 = inlined_call_operand.hbm [shape: f32[32,128], index: 5, kind: input, shape index: {}]   ;;  %s1050_s6 = inlined_call_operand.vmem [shape: f32[1,128], index: 6, kind: input, shape index: {}]   ;;  %s1051_s7 = inlined_call_operand.vmem [shape: bf16[12,128], index: 7, kind: output, shape index: {}]  }
   0x1   :  { %14 = vsyncpa [#allocation3 + $0x1], 0 }
   0x2   :  { %15 = vsyncpa [#allocation5], 0 }
   0x3   :  { %16 = vsyncpa [#allocation8], 0  ;;  %s907_s24 = smov 0   ;;  %s909_s25 = smov 0  }
   0x4   :  { %s911_s26 = smov 0   ;;  %s913_s27 = smov 0  }
   0x5 LB: > { %s216_s30 = sshll.u32 %s1045_s1, 4  ;;  %s931_s8 = sadd.s32 4294967295, %s859_s27   ;;  %s859_s27 = sphi %s913_s27, %s1059_s27   ;;  %s855_s26 = sphi %s911_s26, %s1058_s26   ;;  %s851_s25 = sphi %s909_s25, %s1057_s25   ;;  %s847_s24 = sphi %s907_s24, %s1056_s24   ;;  %s217_s30 = int_to_ptr.hbm [resolvable:$true] %s216_s30 }
   0x6   : > { %p562_p0 = scmp.ge.s32.totalorder %s859_s27, 1  ;;  %p43_p1 = scmp.eq.s32.totalorder %s931_s8, 0 }
   0x7   : > { %p205_p2 = scmp.lt.s32.totalorder %s859_s27, 3  ;;  %s861_s10 = smov [#allocation4]  }
   0x8   : > { %s218_s11 = sshll.u32 %s861_s10, 4  ;;  %s242_s14 = sshll.u32 %s1047_s3, 4  ;;  %s219_s11 = int_to_ptr.vmem [resolvable:$true] %s218_s11  ;;  %s243_s14 = int_to_ptr.hbm [resolvable:$true] %s242_s14 }
   0x9   : > { %p936_p3 = pnand %p562_p0, %p205_p2  ;;  %s231_s18 = sshll.u32 %s1046_s2, 4  ;;  %s232_s18 = int_to_ptr.hbm [resolvable:$true] %s231_s18 }
   0xa   : > { %s862_s19 = smov [#allocation7]   ;;  %s863_s21 = smov 128  }
   0xb   : > { %p600_p4 = pneg %p936_p3  ;;  %s244_s20 = sshll.u32 %s862_s19, 4  ;;  %s245_s20 = int_to_ptr.vmem [resolvable:$true] %s244_s20 }
   0xc   : > { %s864_s22 = smov 8   ;;  %s259_s29 = sshll.u32 %s1049_s5, 4  ;;  %s260_s29 = int_to_ptr.hbm [resolvable:$true] %s259_s29 }
   0xd   : > { %p947_p5 = pnand %p600_p4, %p43_p1  ;;  %s865_s10 = smov [#allocation6]  }
   0xe   : > { %s233_s12 = sshll.u32 %s865_s10, 4  ;;  %s966_s13 = sadd.s32 1, %s859_s27   ;;  %s234_s12 = int_to_ptr.vmem [resolvable:$true] %s233_s12 }
   0xf   : > { %603 = dma.hbm_to_vmem [thread:$0]  (!%p947_p5), %s217_s30, 256, %s219_s11, [#allocation5], %s863_s21, %s863_s21, %s864_s22  }
  0x10   : > { %609 = dma.hbm_to_vmem [thread:$0]  (!%p947_p5), %s243_s14, 512, %s245_s20, [#allocation8], %s863_s21, %s863_s21, %s864_s22  }
  0x11   : > { %606 = dma.hbm_to_vmem [thread:$0]  (!%p947_p5), %s232_s18, 16, %s234_s12, [#allocation5]  }
  0x12   : > { %s866_s30 = smov [#allocation9]   ;;  %s26_s14 = ssub.s32 %s859_s27, %s966_s13 }
  0x13   : > { %s261_s11 = sshll.u32 %s866_s30, 4  ;;  %s29_s16 = sadd.s32 1, %s855_s26  ;;  %s262_s11 = int_to_ptr.vmem [resolvable:$true] %s261_s11 }
  0x14   : > { %612 = dma.hbm_to_vmem [thread:$0]  (!%p947_p5), %s260_s29, 512, %s262_s11, [#allocation8], %s863_s21, %s863_s21, %s864_s22  }
  0x15   : > { %p27_p6 = scmp.eq.s32.totalorder %s26_s14, 0  ;;  %p36_p7 = scmp.ne.s32.totalorder %s855_s26, %s851_s25 }
  0x16   : > { %p37_p8 = scmp.eq.s32.totalorder %s859_s27, 0  ;;  %p42_p9 = scmp.ne.s32.totalorder %s851_s25, %s847_s24 }
  0x17   : > { %s977_s17 = scalar_select %p27_p6, %s855_s26, %s29_s16  }
  0x18   : > { %p981_p10 = por %p43_p1, %p42_p9  ;;  %p621_p11 = scmp.lt.s32.totalorder %s859_s27, 2 }
  0x19   : > { %s278_s19 = sand.u32 1, %s855_s26   ;;  %s569_s15 = sshll.u32 %s859_s27, 3 }
  0x1a   : > { %p38_p12 = por %p37_p8, %p36_p7  ;;  %s568_s20 = sshll.u32 %s278_s19, 3 }
  0x1b   : > { %s286_s23 = scalar_lea.hbm %s1044_s0, %s569_s15  ;;  %s282_s29 = scalar_lea.vmem [#allocation2], %s568_s20 }
  0x1c   : > { %s288_s28 = sshll.u32 %s286_s23, 4  ;;  %s290_s10 = sshll.u32 %s282_s29, 4  ;;  %s289_s28 = int_to_ptr.hbm [resolvable:$true] %s288_s28  ;;  %s291_s10 = int_to_ptr.vmem [resolvable:$true] %s290_s10 }
  0x1d   : > { %p991_p13 = pnand %p621_p11, %p38_p12  ;;  %s279_s12 = scalar_lea.sflag [#allocation3], %s278_s19 }
  0x1e   : > { %s787_s30 = sshra.s32 %s289_s28, 4  ;;  %s794_s16 = scalar_lea.hbm %s1044_s0, 16  ;;  %s788_s30 = int_to_ptr.hbm [resolvable:$true] %s787_s30 }
  0x1f   : > { %s789_s27 = scalar_lea.hbm %s788_s30, 8  ;;  %p791_p2 = pneg %p991_p13 }
  0x20   : > { %p790_p0 = scmp.ne.s32.totalorder %s788_s30, %s789_s27  ;;  %p795_p6 = scmp.lt.s32.totalorder %s788_s30, %s1044_s0 }
  0x21   : > { %p796_p7 = scmp.lt.s32.totalorder %s794_s16, %s789_s27 }
  0x22   : > { %p792_p4 = pnand %p791_p2, %p790_p0 }
  0x23   : > { %p797_p8 = por %p796_p7, %p795_p6 }
  0x24   : > { %p793_p5 = pneg %p792_p4 }
  0x26   : > { %p798_p9 = pnand %p797_p8, %p793_p5 }
  0x28   : > { %801 = shalt.err (!%p798_p9)
}
  0x29   : > { %616 = dma.hbm_to_vmem [thread:$0]  (!%p991_p13), %s289_s28, 128, %s291_s10, %s279_s12  }
  0x2a   : > { %299 = sbr.rel (%p936_p3) target bundleno = 453 (0x1c5), region = 48  ;;  %s301_s19 = sand.u32 (!%p936_p3), 1, %s851_s25  }
  0x2b   : > { %s571_s21 = sshll.u32 (!%p936_p3), %s301_s19, 3  ;;  %s302_s22 = scalar_lea.sflag (!%p936_p3), [#allocation3], %s301_s19 }
  0x2c   : > { %s305_s23 = scalar_lea.vmem (!%p936_p3), [#allocation2], %s571_s21 }
  0x2f   : > { %834 = dma.done.wait (%p981_p10), %s302_s22, 128  }
  0x30   : > { %836 = vsyncadd (%p981_p10), %s302_s22, 4294967168 }
  0x31   : > { %838 = dma.done.wait (%p43_p1), [#allocation5], 272  }
  0x32   : > { %840 = vsyncadd (%p43_p1), [#allocation5], 4294967024 }
  0x33   : > { %842 = dma.done.wait (%p43_p1), [#allocation8], 1024  }
  0x34   : > { %844 = vsyncadd (%p43_p1), [#allocation8], 4294966272  ;;  %v362_v0 = vld [vmem:[#allocation4 + $0x8] sm:$0xff]  ;;  %v361_v1 = vld [vmem:[#allocation4] sm:$0xff]  ;;  %vm367_vm0 = vcmask 130048   ;;  %vm400_vm1 = vcmask 261120  }
  0x35   : > { %385 = vmatpush.msra.mxu0 %v362_v0  ;;  %v360_v2 = vld [vmem:[%s305_s23] sm:$0xff]  ;;  %v394_v4 = vld [vmem:[#allocation7 + $0x10] sm:$0xff]  ;;  %p356_p1 = scmp.lt.s32.totalorder %s931_s8, 1 }
  0x36   : > { %v395_v3 = vld [vmem:[#allocation7 + $0x18] sm:$0xff]  ;;  %v393_v5 = vld [vmem:[#allocation7 + $0x8] sm:$0xff]  ;;  %v392_v6 = vld [vmem:[#allocation7] sm:$0xff] }
  0x37   : > { %416 = vmatpush.msra.mxu1 %v395_v3  ;;  %386 = vmatpush.msra.mxu0 %v361_v1  ;;  %v428_v7 = vld [vmem:[#allocation9 + $0x18] sm:$0xff]  ;;  %v427_v12 = vld [vmem:[#allocation9 + $0x10] sm:$0xff]  ;;  %v426_v13 = vld [vmem:[#allocation9 + $0x8] sm:$0xff]  ;;  %s1061_s8 = smov (!%p356_p1, %s931_s8), 1 }
  0x38   : > { %577 = vmatmul.msk.f32.vlgmr.msra.gmra.mxu0 %vm367_vm0, %v360_v2  ;;  %448 = vmatpush.msra.mxu2 %v428_v7  ;;  %v664_v8 = vld [vmem:[#allocation6] ss:$0 sm:$0xff]  ;;  %v425_v14 = vld [vmem:[#allocation9] sm:$0xff]  ;;  %s576_s10 = sshll.u32 %s1061_s8, 2 }
  0x39   : > { %417 = vmatpush.msra.mxu1 %v394_v4  ;;  %v665_v15 = vld [vmem:[%s1048_s4] ss:$0 sm:$0xff]  ;;  %s359_s30 = scalar_lea.vmem %s1051_s7, %s576_s10 }
  0x3a   : > { %449 = vmatpush.msra.mxu2 %v427_v12  ;;  %v666_v19 = vld [vmem:[%s1050_s6] ss:$0 sm:$0xff] }
  0x3b   : > { %418 = vmatpush.msra.mxu1 %v393_v5 }
  0x3c   : > { %450 = vmatpush.msra.mxu2 %v426_v13 }
  0x3d   : > { %419 = vmatpush.msra.mxu1 %v392_v6 }
  0x3e   : > { %451 = vmatpush.msra.mxu2 %v425_v14 }
  0xb5   : > { %v388_v9 = vpop.f32.mrf.mxu0 }
  0xb6   : > { %v389_v10 = vadd.f32 %v664_v8, %v388_v9 }
  0xb8   : > { %v391_v11 = vmax.f32 %v389_v10, 0.0 }
  0xba   : > { %578 = vmatmul.msk.f32.vlgmr.msra.gmra.mxu1 %vm400_vm1, %v391_v11 }
 0x137   : > { %v421_v16 = vpop.f32.mrf.mxu1 }
 0x138   : > { %v422_v17 = vadd.f32 %v665_v15, %v421_v16 }
 0x13a   : > { %v424_v18 = vmax.f32 %v422_v17, 0.0 }
 0x13c   : > { %579 = vmatmul.msk.f32.vlgmr.msra.gmra.mxu2 %vm400_vm1, %v424_v18 }
 0x1bf   : > { %v453_v20 = vpop.f32.mrf.mxu2 }
 0x1c0   : > { %v454_v21 = vadd.f32 %v666_v19, %v453_v20 }
 0x1c2   : > { %v456_v22 = vpack.c.bf16 %v454_v21, %v454_v21 }
 0x1c4   : > { %457 = vst [vmem:[%s359_s30] sm:$0xf] %v456_v22 }
 0x1c5 PF: > { %p19_p3 = scmp.ge.s32.totalorder %s966_s13, 4   ;;  %s1056_s24 = smov %s851_s25 }
 0x1c6   : > { %s1057_s25 = smov %s855_s26  ;;  %s1058_s26 = smov %s977_s17 }
 0x1c7   : > { %s1059_s27 = smov %s966_s13  ;;  %21 = sbr.rel (!%p19_p3) target bundleno = 5 (0x5), region = 104 }
 0x1cc   :  { %477 = vsyncpa [#allocation3], 1 }
 0x1cd   :  { %479 = vsyncpa [#allocation3 + $0x1], 1 }
 0x1ce   :  { %480 = vsyncpa [#allocation5], 1 }
 0x1cf   :  { %481 = vsyncpa [#allocation8], 1 }

</bundles_post_ra>
